<compile_context>
chip_gen: v5e
topology: v5e:2x2
jax: 0.10.0
libtpu: 0.0.40
codegen_flags: <defaults>
</compile_context>

<pallas_src>
import jax
import jax.numpy as jnp
from jax import lax
from jax.experimental import pallas as pl
from jax.experimental.pallas import tpu as pltpu


# ---------------------------------------------------------------------------
# Phase 1: transformer body (one batch element per grid step)
# ---------------------------------------------------------------------------
def transformer_body_kernel(x_ref, mask_ref,
                            wq_ref, wk_ref, wv_ref, wo_ref,
                            w1_ref, w2_ref,
                            ylast_ref):
    # x_ref:     (1, S, H)  bf16 per-batch embeddings
    # mask_ref:  (1, 1, S)  f32 attention mask (1.0 keep, 0.0 pad)
    # ylast_ref: (1, 1, H)  bf16 last-token hidden state (output)
    S = x_ref.shape[1]
    H = x_ref.shape[2]

    x16 = x_ref[0]                                  # [S, H] bf16 operand
    x32 = x16.astype(jnp.float32)                   # [S, H] f32 residual
    mask = mask_ref[0]                              # [1, S] f32

    # --- masked causal self-attention (bf16 matmuls, f32 accum) -------------
    scale = jnp.float32(1.0) / jnp.sqrt(jnp.float32(H))
    q = jnp.dot(x16, wq_ref[...], preferred_element_type=jnp.float32) * scale
    k = jnp.dot(x16, wk_ref[...], preferred_element_type=jnp.float32)
    v = jnp.dot(x16, wv_ref[...], preferred_element_type=jnp.float32)

    # q @ k^T contracting the last axes (no materialized transpose of k).
    # TODO(synk): confirm via pl.lower_as_mlir that Mosaic does not insert a
    # vxpose of k here; if it does, emit k pre-transposed instead.
    scores = lax.dot_general(
        q.astype(jnp.bfloat16), k.astype(jnp.bfloat16),
        dimension_numbers=(((1,), (1,)), ((), ())),
        preferred_element_type=jnp.float32)          # [S, S] f32

    row = lax.broadcasted_iota(jnp.int32, (S, S), 0)
    col = lax.broadcasted_iota(jnp.int32, (S, S), 1)
    valid = jnp.logical_and(col <= row, mask > 0.5)

    scores = jnp.where(valid, scores, jnp.float32(-1e30))
    scores = scores - jnp.max(scores, axis=-1, keepdims=True)
    p = jnp.exp(scores)
    p = p * pl.reciprocal(jnp.sum(p, axis=-1, keepdims=True), approx=True)

    attn = jnp.dot(p.astype(jnp.bfloat16), v.astype(jnp.bfloat16),
                   preferred_element_type=jnp.float32)              # [S, H]
    y = x32 + jnp.dot(attn.astype(jnp.bfloat16), wo_ref[...],
                      preferred_element_type=jnp.float32)

    # --- MLP block -----------------------------------------------------------
    h = jnp.dot(y.astype(jnp.bfloat16), w1_ref[...],
                preferred_element_type=jnp.float32)                  # [S, F]
    h = jax.nn.gelu(h)
    y2 = y + jnp.dot(h.astype(jnp.bfloat16), w2_ref[...],
                     preferred_element_type=jnp.float32)

    # Keep ONLY the last position; the LM head never touches the other rows.
    ylast_ref[0] = y2[S - 1:S, :].astype(jnp.bfloat16)               # [1, H]


# ---------------------------------------------------------------------------
# Phase 2: stacked LM head, one vocab tile per grid step
# ---------------------------------------------------------------------------
def lm_head_kernel(ylast_ref, wlm_ref, out_ref):
    # ylast_ref: (B, H)        bf16 stacked last-token hiddens (resident)
    # wlm_ref:   (H, TILE_V)   bf16 vocab tile of the LM head (streamed)
    # out_ref:   (B, TILE_V)   f32 logits tile
    out_ref[...] = jnp.dot(ylast_ref[...], wlm_ref[...],
                           preferred_element_type=jnp.float32)


def _clamp_vmem(resident_bytes, *, headroom=1.5, floor=16 << 20, cap=48 << 20):
    """VMEM limit derived from resident buffers, capped for v7x's 64 MiB."""
    want = int(resident_bytes * headroom)
    return max(floor, min(cap, want))


def chatglm_filter_forward(input_ids, attention_mask, params, *, tile_v=512):
    """value = logits[:, -1] of the synthetic causal LM."""
    emb = params["emb"]               # [V, H] bf16
    B, S = input_ids.shape
    V, H = emb.shape
    F = params["w1"].shape[1]

    tile_v = min(tile_v, V)
    assert V % tile_v == 0 and tile_v % 128 == 0
    n_vt = V // tile_v

    # Glue outside the kernel: embedding gather + mask cast.
    x = jnp.take(emb, input_ids, axis=0).astype(jnp.bfloat16)       # [B, S, H]
    mask = attention_mask.astype(jnp.float32).reshape(B, 1, S)      # [B, 1, S]

    # -------------------------- phase 1: body --------------------------------
    def const_wspec(shape):
        # Constant block index across the batch axis -> single-buffered.
        return pl.BlockSpec(shape, lambda b: (0, 0), pipeline_mode=pl.Buffered(1))

    body_weight_bytes = sum(int(params[k].size) * params[k].dtype.itemsize
                            for k in ("wq", "wk", "wv", "wo", "w1", "w2"))
    body_flops = B * (4 * 2 * S * H * H        # q,k,v,o projections
                      + 2 * 2 * S * S * H      # scores + p@v
                      + 2 * 2 * S * H * F)     # MLP
    body_cost = pl.CostEstimate(
        flops=int(body_flops),
        transcendentals=int(B * (S * S + S * F)),
        bytes_accessed=int(x.size * 2 + mask.size * 4 + body_weight_bytes
                           + B * H * 2),
    )
    # pipelined x/mask/out (2 buffers each) + single-buffered weights
    # + dense f32 temporaries ([S,S] scores, [S,F] h, a few [S,H]).
    body_resident = (2 * (S * H * 2 + S * 4 + H * 2)
                     + body_weight_bytes
                     + 4 * (S * S + 2 * S * F + 4 * S * H))

    ylast = pl.pallas_call(
        transformer_body_kernel,
        out_shape=jax.ShapeDtypeStruct((B, 1, H), jnp.bfloat16),
        grid_spec=pltpu.PrefetchScalarGridSpec(
            num_scalar_prefetch=0,
            grid=(B,),
            in_specs=[
                pl.BlockSpec((1, S, H), lambda b: (b, 0, 0)),    # x
                pl.BlockSpec((1, 1, S), lambda b: (b, 0, 0)),    # mask
                const_wspec((H, H)),                             # wq
                const_wspec((H, H)),                             # wk
                const_wspec((H, H)),                             # wv
                const_wspec((H, H)),                             # wo
                const_wspec((H, F)),                             # w1
                const_wspec((F, H)),                             # w2
            ],
            out_specs=pl.BlockSpec((1, 1, H), lambda b: (b, 0, 0)),
        ),
        compiler_params=pltpu.CompilerParams(
            dimension_semantics=("parallel",),
            vmem_limit_bytes=_clamp_vmem(body_resident),
        ),
        cost_estimate=body_cost,
    )(x, mask,
      params["wq"], params["wk"], params["wv"], params["wo"],
      params["w1"], params["w2"])

    ylast2d = ylast.reshape(B, H)                                   # [B, H] bf16

    # -------------------------- phase 2: LM head ------------------------------
    head_cost = pl.CostEstimate(
        flops=int(2 * B * H * V),
        transcendentals=0,
        bytes_accessed=int(B * H * 2 + H * V * 2 + B * V * 4),     # wlm counted ONCE
    )
    head_resident = (B * H * 2                       # ylast, single-buffered
                     + 2 * (H * tile_v * 2)          # wlm tile, double-buffered
                     + 2 * (B * tile_v * 4))         # logits tile, double-buffered

    logits = pl.pallas_call(
        lm_head_kernel,
        out_shape=jax.ShapeDtypeStruct((B, V), jnp.float32),
        grid_spec=pltpu.PrefetchScalarGridSpec(
            num_scalar_prefetch=0,
            grid=(n_vt,),
            in_specs=[
                pl.BlockSpec((B, H), lambda v: (0, 0),
                             pipeline_mode=pl.Buffered(1)),         # ylast (resident)
                pl.BlockSpec((H, tile_v), lambda v: (0, v)),        # wlm (streamed once)
            ],
            out_specs=pl.BlockSpec((B, tile_v), lambda v: (0, v)),
        ),
        compiler_params=pltpu.CompilerParams(
            dimension_semantics=("parallel",),       # both v7x TCs split the wlm stream
            vmem_limit_bytes=_clamp_vmem(head_resident),
        ),
        cost_estimate=head_cost,
    )(ylast2d, params["wlm"])

    return logits                                                    # logits[:, -1]


def init_params(key, vocab, hidden):
    ks = jax.random.split(key, 8)
    s = 0.02

    def w(k, shape):
        return (jax.random.normal(k, shape, jnp.float32) * s).astype(jnp.bfloat16)

    return {
        "emb": w(ks[0], (vocab, hidden)),
        "wq":  w(ks[1], (hidden, hidden)),
        "wk":  w(ks[2], (hidden, hidden)),
        "wv":  w(ks[3], (hidden, hidden)),
        "wo":  w(ks[4], (hidden, hidden)),
        "w1":  w(ks[5], (hidden, 4 * hidden)),
        "w2":  w(ks[6], (4 * hidden, hidden)),
        "wlm": w(ks[7], (hidden, vocab)),
    }


if __name__ == "__main__":
    B, S, H, V = 2, 8, 32, 256

    key = jax.random.PRNGKey(0)
    k_ids, k_params = jax.random.split(key)

    input_ids = jax.random.randint(k_ids, (B, S), 0, V, dtype=jnp.int32)
    attention_mask = jnp.ones((B, S), dtype=jnp.int32)
    params = init_params(k_params, V, H)

    value = chatglm_filter_forward(input_ids, attention_mask, params, tile_v=512)
    jax.block_until_ready(value)

    assert value.shape == (B, V) and value.dtype == jnp.float32
    print("KERNEL_OK")
</pallas_src>

<mosaic_0001>
module attributes {stable_mosaic.version = 11 : i64} {
  func.func @transformer_body_kernel(%arg0: i32, %arg1: memref<1x8x32xbf16, #tpu.memory_space<vmem>>, %arg2: memref<1x1x8xf32, #tpu.memory_space<vmem>>, %arg3: memref<32x32xbf16, #tpu.memory_space<vmem>>, %arg4: memref<32x32xbf16, #tpu.memory_space<vmem>>, %arg5: memref<32x32xbf16, #tpu.memory_space<vmem>>, %arg6: memref<32x32xbf16, #tpu.memory_space<vmem>>, %arg7: memref<32x128xbf16, #tpu.memory_space<vmem>>, %arg8: memref<128x32xbf16, #tpu.memory_space<vmem>>, %arg9: memref<1x1x32xbf16, #tpu.memory_space<vmem>>) attributes {dimension_semantics = [#tpu.dimension_semantics<parallel>], iteration_bounds = array<i64: 2>, scalar_prefetch = 0 : i64, scratch_operands = 0 : i64, tpu.core_type = #tpu.core_type<tc>, window_params = [{transform_indices = @transform_0, window_bounds = array<i64: 1, 8, 32>}, {transform_indices = @transform_1, window_bounds = array<i64: 1, 1, 8>}, {pipeline_mode = #tpu.pipeline_mode<synchronous>, transform_indices = @transform_2, window_bounds = array<i64: 32, 32>}, {pipeline_mode = #tpu.pipeline_mode<synchronous>, transform_indices = @transform_3, window_bounds = array<i64: 32, 32>}, {pipeline_mode = #tpu.pipeline_mode<synchronous>, transform_indices = @transform_4, window_bounds = array<i64: 32, 32>}, {pipeline_mode = #tpu.pipeline_mode<synchronous>, transform_indices = @transform_5, window_bounds = array<i64: 32, 32>}, {pipeline_mode = #tpu.pipeline_mode<synchronous>, transform_indices = @transform_6, window_bounds = array<i64: 32, 128>}, {pipeline_mode = #tpu.pipeline_mode<synchronous>, transform_indices = @transform_7, window_bounds = array<i64: 128, 32>}, {transform_indices = @transform_8, window_bounds = array<i64: 1, 1, 32>}]} {
    %c0 = arith.constant 0 : index
    %c0_0 = arith.constant 0 : index
    %c0_1 = arith.constant 0 : index
    %0 = vector.load %arg1[%c0, %c0_0, %c0_1] : memref<1x8x32xbf16, #tpu.memory_space<vmem>>, vector<1x8x32xbf16>
    %1 = vector.shape_cast %0 : vector<1x8x32xbf16> to vector<8x32xbf16>
    %2 = arith.extf %1 : vector<8x32xbf16> to vector<8x32xf32>
    %c0_2 = arith.constant 0 : index
    %c0_3 = arith.constant 0 : index
    %c0_4 = arith.constant 0 : index
    %3 = vector.load %arg2[%c0_2, %c0_3, %c0_4] : memref<1x1x8xf32, #tpu.memory_space<vmem>>, vector<1x1x8xf32>
    %4 = vector.shape_cast %3 : vector<1x1x8xf32> to vector<1x8xf32>
    %cst = arith.constant 3.200000e+01 : f32
    %5 = math.sqrt %cst : f32
    %cst_5 = arith.constant 1.000000e+00 : f32
    %6 = arith.divf %cst_5, %5 : f32
    %c0_6 = arith.constant 0 : index
    %c0_7 = arith.constant 0 : index
    %7 = vector.load %arg3[%c0_6, %c0_7] : memref<32x32xbf16, #tpu.memory_space<vmem>>, vector<32x32xbf16>
    %cst_8 = arith.constant dense<0.000000e+00> : vector<8x32xf32>
    %8 = tpu.matmul %1, %7, %cst_8 {dimension_numbers = #tpu.dot_dimension_numbers<[1], [0], [0], [1], [0, 0, 1, 1], [], []>} : vector<8x32xbf16>, vector<32x32xbf16>, vector<8x32xf32> -> vector<8x32xf32>
    %9 = vector.broadcast %6 : f32 to vector<8x32xf32>
    %10 = arith.mulf %8, %9 : vector<8x32xf32>
    %c0_9 = arith.constant 0 : index
    %c0_10 = arith.constant 0 : index
    %11 = vector.load %arg4[%c0_9, %c0_10] : memref<32x32xbf16, #tpu.memory_space<vmem>>, vector<32x32xbf16>
    %cst_11 = arith.constant dense<0.000000e+00> : vector<8x32xf32>
    %12 = tpu.matmul %1, %11, %cst_11 {dimension_numbers = #tpu.dot_dimension_numbers<[1], [0], [0], [1], [0, 0, 1, 1], [], []>} : vector<8x32xbf16>, vector<32x32xbf16>, vector<8x32xf32> -> vector<8x32xf32>
    %c0_12 = arith.constant 0 : index
    %c0_13 = arith.constant 0 : index
    %13 = vector.load %arg5[%c0_12, %c0_13] : memref<32x32xbf16, #tpu.memory_space<vmem>>, vector<32x32xbf16>
    %cst_14 = arith.constant dense<0.000000e+00> : vector<8x32xf32>
    %14 = tpu.matmul %1, %13, %cst_14 {dimension_numbers = #tpu.dot_dimension_numbers<[1], [0], [0], [1], [0, 0, 1, 1], [], []>} : vector<8x32xbf16>, vector<32x32xbf16>, vector<8x32xf32> -> vector<8x32xf32>
    %15 = arith.truncf %10 : vector<8x32xf32> to vector<8x32xbf16>
    %16 = arith.truncf %12 : vector<8x32xf32> to vector<8x32xbf16>
    %cst_15 = arith.constant dense<0.000000e+00> : vector<8x8xf32>
    %17 = tpu.matmul %15, %16, %cst_15 {dimension_numbers = #tpu.dot_dimension_numbers<[1], [1], [0], [0], [0, 0, 1, 0], [], []>} : vector<8x32xbf16>, vector<8x32xbf16>, vector<8x8xf32> -> vector<8x8xf32>
    %18 = tpu.iota {dimensions = array<i32: 0>} : vector<8x8xi32>
    %19 = tpu.iota {dimensions = array<i32: 1>} : vector<8x8xi32>
    %20 = arith.cmpi sle, %19, %18 : vector<8x8xi32>
    %cst_16 = arith.constant 5.000000e-01 : f32
    %21 = vector.broadcast %cst_16 : f32 to vector<1x8xf32>
    %22 = arith.cmpf ogt, %4, %21 : vector<1x8xf32>
    %23 = vector.broadcast %22 : vector<1x8xi1> to vector<8x8xi1>
    %24 = arith.andi %20, %23 : vector<8x8xi1>
    %cst_17 = arith.constant -1.000000e+30 : f32
    %25 = vector.broadcast %cst_17 : f32 to vector<8x8xf32>
    %26 = arith.select %24, %17, %25 : vector<8x8xi1>, vector<8x8xf32>
    %cst_18 = arith.constant dense<0xFF800000> : vector<8xf32>
    %27 = vector.multi_reduction <maximumf>, %26, %cst_18 [1] : vector<8x8xf32> to vector<8xf32>
    %28 = vector.shape_cast %27 : vector<8xf32> to vector<8x1xf32>
    %29 = vector.broadcast %28 : vector<8x1xf32> to vector<8x8xf32>
    %30 = arith.subf %26, %29 : vector<8x8xf32>
    %31 = math.exp %30 : vector<8x8xf32>
    %cst_19 = arith.constant dense<0.000000e+00> : vector<8xf32>
    %32 = vector.multi_reduction <add>, %31, %cst_19 [1] : vector<8x8xf32> to vector<8xf32>
    %33 = vector.shape_cast %32 : vector<8xf32> to vector<8x1xf32>
    %34 = tpu.reciprocal %33 {approx = true} : vector<8x1xf32> -> vector<8x1xf32>
    %35 = vector.broadcast %34 : vector<8x1xf32> to vector<8x8xf32>
    %36 = arith.mulf %31, %35 : vector<8x8xf32>
    %37 = arith.truncf %36 : vector<8x8xf32> to vector<8x8xbf16>
    %38 = arith.truncf %14 : vector<8x32xf32> to vector<8x32xbf16>
    %cst_20 = arith.constant dense<0.000000e+00> : vector<8x32xf32>
    %39 = tpu.matmul %37, %38, %cst_20 {dimension_numbers = #tpu.dot_dimension_numbers<[1], [0], [0], [1], [0, 0, 1, 1], [], []>} : vector<8x8xbf16>, vector<8x32xbf16>, vector<8x32xf32> -> vector<8x32xf32>
    %40 = arith.truncf %39 : vector<8x32xf32> to vector<8x32xbf16>
    %c0_21 = arith.constant 0 : index
    %c0_22 = arith.constant 0 : index
    %41 = vector.load %arg6[%c0_21, %c0_22] : memref<32x32xbf16, #tpu.memory_space<vmem>>, vector<32x32xbf16>
    %cst_23 = arith.constant dense<0.000000e+00> : vector<8x32xf32>
    %42 = tpu.matmul %40, %41, %cst_23 {dimension_numbers = #tpu.dot_dimension_numbers<[1], [0], [0], [1], [0, 0, 1, 1], [], []>} : vector<8x32xbf16>, vector<32x32xbf16>, vector<8x32xf32> -> vector<8x32xf32>
    %43 = arith.addf %2, %42 : vector<8x32xf32>
    %44 = arith.truncf %43 : vector<8x32xf32> to vector<8x32xbf16>
    %c0_24 = arith.constant 0 : index
    %c0_25 = arith.constant 0 : index
    %45 = vector.load %arg7[%c0_24, %c0_25] : memref<32x128xbf16, #tpu.memory_space<vmem>>, vector<32x128xbf16>
    %cst_26 = arith.constant dense<0.000000e+00> : vector<8x128xf32>
    %46 = tpu.matmul %44, %45, %cst_26 {dimension_numbers = #tpu.dot_dimension_numbers<[1], [0], [0], [1], [0, 0, 1, 1], [], []>} : vector<8x32xbf16>, vector<32x128xbf16>, vector<8x128xf32> -> vector<8x128xf32>
    %47 = arith.mulf %46, %46 : vector<8x128xf32>
    %48 = arith.mulf %46, %47 : vector<8x128xf32>
    %cst_27 = arith.constant 4.471500e-02 : f32
    %49 = vector.broadcast %cst_27 : f32 to vector<8x128xf32>
    %50 = arith.mulf %49, %48 : vector<8x128xf32>
    %51 = arith.addf %46, %50 : vector<8x128xf32>
    %cst_28 = arith.constant 0.797884583 : f32
    %52 = vector.broadcast %cst_28 : f32 to vector<8x128xf32>
    %53 = arith.mulf %52, %51 : vector<8x128xf32>
    %54 = math.tanh %53 : vector<8x128xf32>
    %cst_29 = arith.constant 1.000000e+00 : f32
    %55 = vector.broadcast %cst_29 : f32 to vector<8x128xf32>
    %56 = arith.addf %55, %54 : vector<8x128xf32>
    %cst_30 = arith.constant 5.000000e-01 : f32
    %57 = vector.broadcast %cst_30 : f32 to vector<8x128xf32>
    %58 = arith.mulf %57, %56 : vector<8x128xf32>
    %59 = arith.mulf %46, %58 : vector<8x128xf32>
    %60 = arith.truncf %59 : vector<8x128xf32> to vector<8x128xbf16>
    %c0_31 = arith.constant 0 : index
    %c0_32 = arith.constant 0 : index
    %61 = vector.load %arg8[%c0_31, %c0_32] : memref<128x32xbf16, #tpu.memory_space<vmem>>, vector<128x32xbf16>
    %cst_33 = arith.constant dense<0.000000e+00> : vector<8x32xf32>
    %62 = tpu.matmul %60, %61, %cst_33 {dimension_numbers = #tpu.dot_dimension_numbers<[1], [0], [0], [1], [0, 0, 1, 1], [], []>} : vector<8x128xbf16>, vector<128x32xbf16>, vector<8x32xf32> -> vector<8x32xf32>
    %63 = arith.addf %43, %62 : vector<8x32xf32>
    %64 = vector.extract_strided_slice %63 {offsets = [7, 0], sizes = [1, 32], strides = [1, 1]} : vector<8x32xf32> to vector<1x32xf32>
    %65 = arith.truncf %64 : vector<1x32xf32> to vector<1x32xbf16>
    %c0_34 = arith.constant 0 : index
    %c0_35 = arith.constant 0 : index
    %c0_36 = arith.constant 0 : index
    %66 = vector.load %arg9[%c0_34, %c0_35, %c0_36] : memref<1x1x32xbf16, #tpu.memory_space<vmem>>, vector<1x1x32xbf16>
    %67 = vector.shape_cast %66 : vector<1x1x32xbf16> to vector<1x32xbf16>
    %68 = vector.shape_cast %65 : vector<1x32xbf16> to vector<1x1x32xbf16>
    tpu.vector_store %arg9[%c0_34, %c0_35, %c0_36], %68 {strides = array<i32>} : memref<1x1x32xbf16, #tpu.memory_space<vmem>>, vector<1x1x32xbf16>,
    return
  }
  func.func @transform_0(%arg0: i32) -> (i32, i32, i32) {
    %c0_i32 = arith.constant 0 : i32
    %c0_i32_0 = arith.constant 0 : i32
    %c0_i32_1 = arith.constant 0 : i32
    return %arg0, %c0_i32, %c0_i32_0 : i32, i32, i32
  }
  func.func @transform_1(%arg0: i32) -> (i32, i32, i32) {
    %c0_i32 = arith.constant 0 : i32
    %c0_i32_0 = arith.constant 0 : i32
    %c0_i32_1 = arith.constant 0 : i32
    return %arg0, %c0_i32, %c0_i32_0 : i32, i32, i32
  }
  func.func @transform_2(%arg0: i32) -> (i32, i32) {
    %c0_i32 = arith.constant 0 : i32
    %c0_i32_0 = arith.constant 0 : i32
    %c0_i32_1 = arith.constant 0 : i32
    return %c0_i32, %c0_i32_0 : i32, i32
  }
  func.func @transform_3(%arg0: i32) -> (i32, i32) {
    %c0_i32 = arith.constant 0 : i32
    %c0_i32_0 = arith.constant 0 : i32
    %c0_i32_1 = arith.constant 0 : i32
    return %c0_i32, %c0_i32_0 : i32, i32
  }
  func.func @transform_4(%arg0: i32) -> (i32, i32) {
    %c0_i32 = arith.constant 0 : i32
    %c0_i32_0 = arith.constant 0 : i32
    %c0_i32_1 = arith.constant 0 : i32
    return %c0_i32, %c0_i32_0 : i32, i32
  }
  func.func @transform_5(%arg0: i32) -> (i32, i32) {
    %c0_i32 = arith.constant 0 : i32
    %c0_i32_0 = arith.constant 0 : i32
    %c0_i32_1 = arith.constant 0 : i32
    return %c0_i32, %c0_i32_0 : i32, i32
  }
  func.func @transform_6(%arg0: i32) -> (i32, i32) {
    %c0_i32 = arith.constant 0 : i32
    %c0_i32_0 = arith.constant 0 : i32
    %c0_i32_1 = arith.constant 0 : i32
    return %c0_i32, %c0_i32_0 : i32, i32
  }
  func.func @transform_7(%arg0: i32) -> (i32, i32) {
    %c0_i32 = arith.constant 0 : i32
    %c0_i32_0 = arith.constant 0 : i32
    %c0_i32_1 = arith.constant 0 : i32
    return %c0_i32, %c0_i32_0 : i32, i32
  }
  func.func @transform_8(%arg0: i32) -> (i32, i32, i32) {
    %c0_i32 = arith.constant 0 : i32
    %c0_i32_0 = arith.constant 0 : i32
    %c0_i32_1 = arith.constant 0 : i32
    return %arg0, %c0_i32, %c0_i32_0 : i32, i32, i32
  }
}

</mosaic_0001>

<bundles_post_ra>
// kernel: tpu_custom_call.1
= control target key start
LH: loop header
LB: loop body
LE: loop exit
PB: predicated region body
PF: predicated region fallthrough
CT: control target
= control target key end

     0   :  { %13 = vsyncpa [#allocation3], 0  ;;  %s1275_s0 = inlined_call_operand.hbm [shape: bf16[2,8,32], index: 0, kind: input, shape index: {}]   ;;  %s1276_s1 = inlined_call_operand.hbm [shape: f32[2,1,8], index: 1, kind: input, shape index: {}]   ;;  %s1277_s2 = inlined_call_operand.vmem [shape: bf16[32,32], index: 2, kind: input, shape index: {}]   ;;  %s1278_s3 = inlined_call_operand.vmem [shape: bf16[32,32], index: 3, kind: input, shape index: {}]   ;;  %s1279_s4 = inlined_call_operand.vmem [shape: bf16[32,32], index: 4, kind: input, shape index: {}]   ;;  %s1280_s5 = inlined_call_operand.vmem [shape: bf16[32,32], index: 5, kind: input, shape index: {}]   ;;  %s1281_s6 = inlined_call_operand.vmem [shape: bf16[32,128], index: 6, kind: input, shape index: {}]   ;;  %s1282_s7 = inlined_call_operand.vmem [shape: bf16[128,32], index: 7, kind: input, shape index: {}]   ;;  %s1283_s8 = inlined_call_operand.vmem [shape: bf16[2,1,32], index: 8, kind: output, shape index: {}]  }
   0x1   :  { %15 = vsyncpa [#allocation3 + $0x1], 0 }
   0x2   :  { %16 = vsyncpa [#allocation5], 0 }
   0x3   :  { %18 = vsyncpa [#allocation5 + $0x1], 0  ;;  %s1071_s27 = smov 0   ;;  %s1073_s28 = smov 0  }
   0x4   :  { %s1075_s29 = smov 0   ;;  %s1077_s30 = smov 0  }
   0x5 LB: > { %s1090_s9 = sadd.s32 4294967295, %s1023_s30   ;;  %s1093_s10 = sadd.s32 1, %s1023_s30   ;;  %s1023_s30 = sphi %s1077_s30, %s1291_s30   ;;  %s1019_s29 = sphi %s1075_s29, %s1290_s29   ;;  %s1015_s28 = sphi %s1073_s28, %s1289_s28   ;;  %s1011_s27 = sphi %s1071_s27, %s1288_s27  }
   0x6   : > { %s28_s11 = ssub.s32 %s1023_s30, %s1093_s10  ;;  %s31_s12 = sadd.s32 1, %s1019_s29 }
   0x7   : > { %p29_p0 = scmp.eq.s32.totalorder %s28_s11, 0  ;;  %p38_p1 = scmp.ne.s32.totalorder %s1019_s29, %s1015_s28 }
   0x8   : > { %p39_p2 = scmp.eq.s32.totalorder %s1023_s30, 0  ;;  %p44_p3 = scmp.ne.s32.totalorder %s1015_s28, %s1011_s27 }
   0x9   : > { %s1103_s13 = scalar_select %p29_p0, %s1019_s29, %s31_s12  }
   0xa   : > { %p1105_p4 = por %p39_p2, %p38_p1  ;;  %p45_p5 = scmp.eq.s32.totalorder %s1090_s9, 0 }
   0xb   : > { %p885_p6 = scmp.lt.s32.totalorder %s1023_s30, 2  ;;  %s1116_s16 = sand.u32 1, %s1019_s29  }
   0xc   : > { %p1111_p7 = por %p45_p5, %p44_p3  ;;  %s770_s17 = sshll.u32 %s1116_s16, 2 }
   0xd   : > { %s771_s18 = sshll.u32 %s1023_s30, 2  ;;  %s268_s22 = scalar_lea.vmem [#allocation2], %s770_s17 }
   0xe   : > { %s272_s21 = scalar_lea.hbm %s1275_s0, %s771_s18  ;;  %s276_s23 = sshll.u32 %s268_s22, 4  ;;  %s277_s23 = int_to_ptr.vmem [resolvable:$true] %s276_s23 }
   0xf   : > { %s274_s24 = sshll.u32 %s272_s21, 4  ;;  %p1125_p8 = pnand %p885_p6, %p1105_p4  ;;  %s275_s24 = int_to_ptr.hbm [resolvable:$true] %s274_s24 }
  0x10   : > { %p772_p9 = scmp.ge.s32.totalorder %s1023_s30, 1  ;;  %p298_p10 = scmp.lt.s32.totalorder %s1023_s30, 3 }
  0x11   : > { %s265_s26 = scalar_lea.sflag [#allocation3], %s1116_s16  ;;  %s925_s27 = sshra.s32 %s275_s24, 4  ;;  %s926_s27 = int_to_ptr.hbm [resolvable:$true] %s925_s27 }
  0x12   : > { %s927_s11 = scalar_lea.hbm %s926_s27, 4  ;;  %p929_p12 = pneg %p1125_p8 }
  0x13   : > { %p928_p11 = scmp.ne.s32.totalorder %s926_s27, %s927_s11  ;;  %s932_s17 = scalar_lea.hbm %s1275_s0, 8 }
  0x14   : > { %p933_p1 = scmp.lt.s32.totalorder %s926_s27, %s1275_s0  ;;  %p934_p2 = scmp.lt.s32.totalorder %s932_s17, %s927_s11 }
  0x15   : > { %p930_p13 = pnand %p929_p12, %p928_p11 }
  0x16   : > { %p935_p3 = por %p934_p2, %p933_p1 }
  0x17   : > { %p931_p0 = pneg %p930_p13 }
  0x19   : > { %p936_p4 = pnand %p935_p3, %p931_p0 }
  0x1b   : > { %939 = shalt.err (!%p936_p4)
}
  0x1c   : > { %881 = dma.hbm_to_vmem [thread:$0]  (!%p1125_p8), %s275_s24, 64, %s277_s23, %s265_s26  }
  0x1d   : > { %p1149_p5 = pnand %p772_p9, %p298_p10  ;;  %s289_s27 = scalar_lea.hbm %s1276_s1, %s1023_s30 }
  0x1e   : > { %s286_s11 = scalar_lea.vmem [#allocation4], %s1116_s16  ;;  %s291_s14 = sshll.u32 %s289_s27, 4  ;;  %s292_s14 = int_to_ptr.hbm [resolvable:$true] %s291_s14 }
  0x1f   : > { %s293_s12 = sshll.u32 %s286_s11, 4  ;;  %s284_s17 = scalar_lea.sflag [#allocation5], %s1116_s16  ;;  %s294_s12 = int_to_ptr.vmem [resolvable:$true] %s293_s12 }
  0x20   : > { %s955_s18 = sshra.s32 %s292_s14, 4  ;;  %s962_s26 = scalar_lea.hbm %s1276_s1, 2  ;;  %s956_s18 = int_to_ptr.hbm [resolvable:$true] %s955_s18 }
  0x21   : > { %s957_s19 = scalar_lea.hbm %s956_s18, 1  ;;  %p963_p11 = scmp.lt.s32.totalorder %s956_s18, %s1276_s1 }
  0x22   : > { %p958_p6 = scmp.ne.s32.totalorder %s956_s18, %s957_s19  ;;  %p964_p13 = scmp.lt.s32.totalorder %s962_s26, %s957_s19 }
  0x24   : > { %p960_p9 = pnand %p958_p6, %p929_p12  ;;  %p965_p0 = por %p964_p13, %p963_p11 }
  0x26   : > { %p961_p10 = pneg %p960_p9 }
  0x28   : > { %p966_p1 = pnand %p965_p0, %p961_p10 }
  0x2a   : > { %969 = shalt.err (!%p966_p1)
}
  0x2b   : > { %884 = dma.hbm_to_vmem [thread:$0]  (!%p1125_p8), %s292_s14, 16, %s294_s12, %s284_s17  }
  0x2c   : > { %302 = sbr.rel (%p1149_p5) target bundleno = 1149 (0x47d), region = 52  ;;  %s1173_s16 = sand.u32 (!%p1149_p5), 1, %s1015_s28  }
  0x2d   : > { %s773_s22 = sshll.u32 (!%p1149_p5), %s1173_s16, 2  ;;  %s305_s27 = scalar_lea.sflag (!%p1149_p5), [#allocation3], %s1173_s16 }
  0x2e   : > { %s308_s11 = scalar_lea.vmem (!%p1149_p5), [#allocation2], %s773_s22 }
  0x31   : > { %1002 = dma.done.wait (%p1111_p7), %s305_s27, 64  }
  0x32   : > { %1004 = vsyncadd (%p1111_p7), %s305_s27, 4294967232  ;;  %s315_s25 = scalar_lea.sflag [#allocation5], %s1173_s16  ;;  %s317_s20 = scalar_lea.vmem [#allocation4], %s1173_s16 }
  0x33   : > { %1006 = dma.done.wait (%p1111_p7), %s315_s25, 16  }
  0x34   : > { %1008 = vsyncadd (%p1111_p7), %s315_s25, 4294967280  ;;  %v857_v0 = vld [vmem:[%s1277_s2 + $0x8] sm:$0xff]  ;;  %v856_v2 = vld [vmem:[%s1277_s2] sm:$0xff]  ;;  %vm376_vm0 = vcmask 261120   ;;  %v473_v16 = vlaneseq  ;;  %v1025_v17 = vmov 0   ;;  %vm484_vm5 = vcmask 64512  }
  0x35   : > { %v859_v1 = vld [vmem:[%s1278_s3 + $0x8] sm:$0xff]  ;;  %386 = vmatpush.bf16.msra.mxu0 %v857_v0  ;;  %v858_v3 = vld [vmem:[%s1278_s3] sm:$0xff]  ;;  %vm501_vm6 = vcmask 1043456   ;;  %v873_v46 = vld [vmem:[%s1282_s7 + $0x38] sm:$0xff]  ;;  %p353_p7 = scmp.lt.s32.totalorder %s1090_s9, 1  ;;  %vm683_vm7 = vcmask 253952  }
  0x36   : > { %416 = vmatpush.bf16.msra.mxu1 %v859_v1  ;;  %v1199_v4 = vld [vmem:[%s308_s11] sm:$0xf]  ;;  %v860_v14 = vld [vmem:[%s1279_s4] sm:$0xff]  ;;  %v474_v19 = vshrl.u32 %v473_v16, 7  ;;  %v476_v20 = vand.u32 127, %v473_v16  ;;  %v872_v47 = vld [vmem:[%s1282_s7 + $0x30] sm:$0xff] }
  0x37   : > { %v861_v13 = vld [vmem:[%s1279_s4 + $0x8] sm:$0xff]  ;;  %v359_v15 = vld [vmem:[%s317_s20] sm:$0x1]  ;;  %v358_v48 = vunpack.c.l.bf16 %v1199_v4  ;;  %v869_v55 = vld [vmem:[%s1282_s7 + $0x18] sm:$0xff]  ;;  %s1293_s9 = smov (!%p353_p7, %s1090_s9), 1 }
  0x38   : > { %445 = vmatpush.bf16.msra.mxu2 %v861_v13  ;;  %vm478_vm1 = vcmp.gt.f32.partialorder %v359_v15, 0.5  ;;  %vm477_vm2 = vcmp.le.s32.totalorder %v476_v20, %v474_v19  ;;  %v863_v35 = vld [vmem:[%s1280_s5 + $0x8] sm:$0xff]  ;;  %v862_v36 = vld [vmem:[%s1280_s5] sm:$0xff]  ;;  %v868_v56 = vld [vmem:[%s1282_s7 + $0x10] sm:$0xff]  ;;  %s355_s19 = scalar_lea.vmem %s1283_s8, %s1293_s9  ;;  %vm684_vm8 = vsmask.f32 256 }
  0x39   : > { %387 = vmatpush.bf16.msra.mxu0 %v856_v2  ;;  %v479_v18 = vsel %vm478_vm1, 1, %v1025_v17  ;;  %v865_v41 = vld [vmem:[%s1281_s6 + $0x8] sm:$0xff]  ;;  %v864_v42 = vld [vmem:[%s1281_s6] sm:$0xff]  ;;  %vm685_vm9 = vmand %vm683_vm7, %vm684_vm8 }
  0x3a   : > { %417 = vmatpush.bf16.msra.mxu1 %v858_v3  ;;  %v480_v21 = vperm.slane %v479_v18, 0  ;;  %v871_v53 = vld [vmem:[%s1282_s7 + $0x28] sm:$0xff]  ;;  %v870_v54 = vld [vmem:[%s1282_s7 + $0x20] sm:$0xff] }
  0x3b   : > { %v867_v57 = vld [vmem:[%s1282_s7 + $0x8] sm:$0xff]  ;;  %v866_v58 = vld [vmem:[%s1282_s7] sm:$0xff] }
  0x3c   : > { %782 = vmatmul.msk.bf16.vlgmr.msra.gmra.mxu0 %vm376_vm0, %v1199_v4  ;;  %446 = vmatpush.bf16.msra.mxu2 %v860_v14  ;;  %vm481_vm3 = vcmp.eq.s32.totalorder %v480_v21, 1 }
  0x3d   : > { %791 = vmatmul.msk.bf16.vlgmr.msra.gmra.mxu1 %vm376_vm0, %v1199_v4  ;;  %vm482_vm4 = vmand %vm477_vm2, %vm481_vm3 }
  0x3e   : > { %544 = vmatpush.bf16.msrb.mxu1 %v863_v35 }
  0x3f   : > { %800 = vmatmul.msk.bf16.vlgmr.msra.gmra.mxu2 %vm376_vm0, %v1199_v4 }
  0x40   : > { %578 = vmatpush.bf16.msrb.mxu2 %v865_v41 }
  0x42   : > { %545 = vmatpush.bf16.msrb.mxu1 %v862_v36 }
  0x44   : > { %579 = vmatpush.bf16.msrb.mxu2 %v864_v42 }
  0xb9   : > { %v389_v5 = vpop.f32.mrf.mxu0 }
  0xba   : > { %v419_v6 = vpop.f32.mrf.mxu1  ;;  %v393_v8 = vmul.f32 0.17677669, %v389_v5 }
  0xbb   : > { %v453_v7 = vpack.c.bf16 %v419_v6, %v419_v6 }
  0xbc   : > { %v452_v10 = vpack.c.bf16 %v393_v8, %v393_v8 }
  0xbd   : > { %v458_v9 = vsel %vm376_vm0, %v453_v7, 0 }
  0xbe   : > { %467 = vmatpush.bf16.xpose.msra.mxu3 %v458_v9 }
  0xc1   : > { %v391_v11 = vpop.f32.mrf.mxu0 }
  0xc2   : > { %v421_v12 = vpop.f32.mrf.mxu1  ;;  %v448_v26 = vpop.f32.mrf.mxu2 }
  0xc3   : > { %v497_v27 = vpack.c.bf16 %v448_v26, %v448_v26  ;;  %v686_v12 = vld [vmem:[%s355_s19] sm:$0x1] }
  0xc5   : > { %801 = vmatmul.msk.bf16.vlgmr.msra.gmra.mxu3 %vm376_vm0, %v452_v10  ;;  %v503_v30 = vsel %vm501_vm6, %v497_v27, 0 }
  0xc6   : > { %512 = vmatpush.bf16.msrb.mxu0 %v503_v30  ;;  %659 = vmatpush.bf16.msrb.mxu3 %v873_v46 }
  0xca   : > { %v450_v32 = vpop.f32.mrf.mxu2  ;;  %660 = vmatpush.bf16.msrb.mxu3 %v872_v47 }
  0xce   : > { %661 = vmatpush.bf16.msrb.mxu3 %v871_v53 }
  0xd2   : > { %662 = vmatpush.bf16.msrb.mxu3 %v870_v54 }
  0xd6   : > { %663 = vmatpush.bf16.msrb.mxu3 %v869_v55 }
  0xda   : > { %664 = vmatpush.bf16.msrb.mxu3 %v868_v56 }
  0xde   : > { %665 = vmatpush.bf16.msrb.mxu3 %v867_v57 }
  0xe2   : > { %666 = vmatpush.bf16.msrb.mxu3 %v866_v58 }
 0x148   : > { %v469_v22 = vpop.f32.mrf.mxu3 }
 0x149   : > { %v483_v23 = vsel %vm482_vm4, %v469_v22, -1e+30 }
 0x14a   : > { %v485_v24 = vsel %vm484_vm5, %v483_v23, -inf }
 0x14b   : > { %486 = vmax.xlane.f32.xlu0 %v485_v24 }
 0x150   : > { %v471_v25 = vpop.f32.mrf.mxu3 }
 0x1be   : > { %v487_v28 = vpop.xlane.xlu0 %486 }
 0x1bf   : > { %v488_v29 = vsub.f32 %v483_v23, %v487_v28 }
 0x1c1   : > { %v489_v31 = vmul.f32 1.442695, %v488_v29 }
 0x1c3   : > { %919 = vpow2.f32 %v489_v31 }
 0x1c9   : > { %v920_v33 = vpop.eup %919 }
 0x1ca   : > { %v491_v34 = vsel %vm484_vm5, %v920_v33, 0.0 }
 0x1cb   : > { %492 = vadd.xlane.f32.xlu0 %v491_v34 }
 0x23e   : > { %v493_v37 = vpop.xlane.xlu0 %492 }
 0x23f   : > { %921 = vrcp.f32 %v493_v37 }
 0x245   : > { %v922_v38 = vpop.eup %921 }
 0x246   : > { %v495_v39 = vmul.f32 %v922_v38, %v920_v33 }
 0x248   : > { %v496_v40 = vpack.c.bf16 %v495_v39, %v495_v39 }
 0x24a   : > { %802 = vmatmul.msk.bf16.vlgmr.msrb.gmra.mxu0 %vm484_vm5, %v496_v40 }
 0x2c7   : > { %v514_v43 = vpop.f32.mrf.mxu0 }
 0x2c8   : > { %v518_v44 = vpack.c.bf16 %v514_v43, %v514_v43 }
 0x2ca   : > { %811 = vmatmul.msk.bf16.vlgmr.msrb.gmra.mxu1 %vm376_vm0, %v518_v44 }
 0x2cf   : > { %v516_v45 = vpop.f32.mrf.mxu0 }
 0x347   : > { %v547_v49 = vpop.f32.mrf.mxu1 }
 0x348   : > { %v551_v50 = vadd.f32 %v547_v49, %v358_v48 }
 0x34a   : > { %v552_v51 = vpack.c.bf16 %v551_v50, %v551_v50 }
 0x34c   : > { %820 = vmatmul.msk.bf16.vlgmr.msrb.gmra.mxu2 %vm376_vm0, %v552_v51 }
 0x34f   : > { %v549_v52 = vpop.f32.mrf.mxu1 }
 0x3cf   : > { %v581_v59 = vpop.f32.mrf.mxu2 }
 0x3d0   : > { %v585_v60 = vmul.f32 %v581_v59, %v581_v59 }
 0x3d2   : > { %v586_v61 = vmul.f32 %v585_v60, %v581_v59 }
 0x3d4   : > { %v587_v62 = vmul.f32 0.044715, %v586_v61 }
 0x3d6   : > { %v588_v63 = vadd.f32 %v587_v62, %v581_v59 }
 0x3d7   : > { %v583_v0 = vpop.f32.mrf.mxu2 }
 0x3d8   : > { %v589_v1 = vmul.f32 0.7978846, %v588_v63 }
 0x3da   : > { %923 = vtanh.f32 %v589_v1 }
 0x3e0   : > { %v924_v2 = vpop.eup %923 }
 0x3e1   : > { %v591_v3 = vadd.f32 1.0, %v924_v2 }
 0x3e3   : > { %v592_v4 = vmul.f32 0.5, %v591_v3 }
 0x3e5   : > { %v593_v5 = vmul.f32 %v592_v4, %v581_v59 }
 0x3e7   : > { %v594_v6 = vpack.c.bf16 %v593_v5, %v593_v5 }
 0x3e9   : > { %667 = vmatmul.bf16.vlgmr.msrb.gmra.mxu3 %v594_v6 }
 0x46c   : > { %v668_v7 = vpop.f32.mrf.mxu3 }
 0x46d   : > { %v672_v8 = vadd.f32 %v668_v7, %v551_v50 }
 0x46f   : > { %v673_v9 = vpack.c.bf16 %v672_v8, %v672_v8 }
 0x471   : > { %675 = vst [vmem:[#allocation1] sm:$0xff] %v673_v9 }
 0x474   : > { %v670_v10 = vpop.f32.mrf.mxu3 }
 0x478   : > { %v677_v11 = vld [vmem:[#allocation1 + $0x3] ss:$4 sm:$0xff] }
 0x479   : > { %v678_v13 = vshrl.u32 %v677_v11, 16 }
 0x47b   : > { %v687_v14 = vsel %vm685_vm9, %v678_v13, %v686_v12 }
 0x47c   : > { %688 = vst [vmem:[%s355_s19] sm:$0x1] %v687_v14 }
 0x47d PF: > { %p21_p8 = scmp.ge.s32.totalorder %s1093_s10, 4   ;;  %s1288_s27 = smov %s1015_s28 }
 0x47e   : > { %s1289_s28 = smov %s1019_s29  ;;  %s1290_s29 = smov %s1103_s13 }
 0x47f   : > { %s1291_s30 = smov %s1093_s10  ;;  %23 = sbr.rel (!%p21_p8) target bundleno = 5 (0x5), region = 106 }
 0x484   :  { %706 = vsyncpa [#allocation3], 1 }
 0x485   :  { %708 = vsyncpa [#allocation3 + $0x1], 1 }
 0x486   :  { %709 = vsyncpa [#allocation5], 1 }
 0x487   :  { %711 = vsyncpa [#allocation5 + $0x1], 1 }

</bundles_post_ra>
